<compile_context>
chip_gen: v6e
topology: v6e:2x2x1
jax: 0.10.0
libtpu: 0.0.40
codegen_flags: <defaults>
</compile_context>

<pallas_src>
import jax
import jax.numpy as jnp
from jax.experimental import pallas as pl
from jax.experimental.pallas import tpu as pltpu

# ---- static module hyper-parameters (from the PyTorch __init__) -------------
C_IN = 1
C_OUT = 16
K_H, K_W = 0, 16
S_H, S_W = 1, 8
P_H, P_W = 0, 14


def _out_size(in_size, stride, pad, k):
    return (in_size - 1) * stride - 2 * pad + k


def convt_sigmoid_kernel(b_ref, o_ref):
    """Pallas TPU kernel: (empty) transposed-conv accumulation + bias + sigmoid.

    b_ref: (C_OUT, 1, 1)           f32 VMEM   (per-output-channel bias, column layout)
    o_ref: (C_OUT, H_out, W_out)   f32 VMEM   (final NCHW-minus-batch layout)

    With kernel_size = (0, 16) the weight has zero elements, so the reduction over
    (ic, kh, kw) is an empty sum and the input contributes nothing; only
    bias + sigmoid remain.  The 16 sigmoids run on the EUP over the small bias tile
    (2 sublane groups), then a dense broadcast store fills the output.
    """
    # TODO(synk): the general scatter-accumulate conv-transpose path is unreachable
    # here (K_H == 0 -> empty weight); do not reuse this kernel for nonzero kernels.
    sig_b = jax.nn.sigmoid(b_ref[...])                 # (C_OUT, 1, 1)
    o_ref[...] = jnp.broadcast_to(sig_b, o_ref.shape)  # broadcast store over (H, W)


def model_forward(x_nchw, weight, bias):
    """Forward pass of the PyTorch Model: sigmoid(conv_transpose2d(x))."""
    n, c_in, h_in, w_in = x_nchw.shape
    assert n == 1 and c_in == C_IN
    assert weight.shape == (C_IN, C_OUT, K_H, K_W)  # zero-element weight
    assert bias.shape == (C_OUT,), bias.shape

    h_out = _out_size(h_in, S_H, P_H, K_H)   # 2
    w_out = _out_size(w_in, S_W, P_W, K_W)   # 372

    b3d = bias.reshape(C_OUT, 1, 1).astype(jnp.float32)

    out_bytes = C_OUT * h_out * w_out * 4
    cost = pl.CostEstimate(
        flops=0,
        transcendentals=C_OUT,
        bytes_accessed=out_bytes + C_OUT * 4,
    )

    # Note: x_nchw is intentionally NOT passed to the kernel — with an empty weight
    # it is mathematically unused, so we skip its HBM->VMEM DMA entirely.
    out3d = pl.pallas_call(
        convt_sigmoid_kernel,
        out_shape=jax.ShapeDtypeStruct((C_OUT, h_out, w_out), jnp.float32),
        # Tiny tensors: whole arrays live in VMEM as single blocks (no grid).
        in_specs=[pl.BlockSpec(memory_space=pltpu.MemorySpace.VMEM)],
        out_specs=pl.BlockSpec(memory_space=pltpu.MemorySpace.VMEM),
        cost_estimate=cost,
    )(b3d)

    # Leading batch-1 axis only: metadata-only reshape, no relayout copy.
    return out3d[None]


if __name__ == "__main__":
    key = jax.random.PRNGKey(0)
    kx, kb = jax.random.split(key)

    # Input shape exactly as in the PyTorch program: (1, 1, 3, 49).
    x1 = jax.random.normal(kx, (1, 1, 3, 49), dtype=jnp.float32)

    # Deterministic parameter init (weight has 0 elements by construction).
    weight = jnp.zeros((C_IN, C_OUT, K_H, K_W), dtype=jnp.float32)
    bias = 0.1 * jax.random.normal(kb, (C_OUT,), dtype=jnp.float32)

    out = model_forward(x1, weight, bias)
    out = jax.block_until_ready(out)

    # Reference: empty kernel taps -> pre-activation == bias -> sigmoid(bias).
    h_out = _out_size(3, S_H, P_H, K_H)
    w_out = _out_size(49, S_W, P_W, K_W)
    expected = jnp.broadcast_to(
        jax.nn.sigmoid(bias)[None, :, None, None],
        (1, C_OUT, h_out, w_out),
    )

    assert out.shape == (1, C_OUT, h_out, w_out), out.shape
    assert bool(jnp.allclose(out, expected, atol=1e-6)), "mismatch vs reference"
    print("KERNEL_OK")
</pallas_src>

<mosaic_0001>
module attributes {stable_mosaic.version = 11 : i64} {
  func.func @convt_sigmoid_kernel(%arg0: memref<16x1x1xf32, #tpu.memory_space<vmem>>, %arg1: memref<16x2x372xf32, #tpu.memory_space<vmem>>) attributes {dimension_semantics = [], scalar_prefetch = 0 : i64, scratch_operands = 0 : i64, tpu.core_type = #tpu.core_type<tc>} {
    %c0 = arith.constant 0 : index
    %c0_0 = arith.constant 0 : index
    %c0_1 = arith.constant 0 : index
    %0 = vector.load %arg0[%c0, %c0_0, %c0_1] : memref<16x1x1xf32, #tpu.memory_space<vmem>>, vector<16x1x1xf32>
    %1 = arith.negf %0 : vector<16x1x1xf32>
    %2 = math.exp %1 : vector<16x1x1xf32>
    %cst = arith.constant 1.000000e+00 : f32
    %3 = vector.broadcast %cst : f32 to vector<16x1x1xf32>
    %4 = arith.addf %3, %2 : vector<16x1x1xf32>
    %5 = arith.divf %3, %4 : vector<16x1x1xf32>
    %6 = vector.shape_cast %5 : vector<16x1x1xf32> to vector<16x1x1xf32>
    %7 = vector.broadcast %6 : vector<16x1x1xf32> to vector<16x2x372xf32>
    %c0_2 = arith.constant 0 : index
    %c0_3 = arith.constant 0 : index
    %c0_4 = arith.constant 0 : index
    %8 = vector.load %arg1[%c0_2, %c0_3, %c0_4] : memref<16x2x372xf32, #tpu.memory_space<vmem>>, vector<16x2x372xf32>
    tpu.vector_store %arg1[%c0_2, %c0_3, %c0_4], %7 {strides = array<i32>} : memref<16x2x372xf32, #tpu.memory_space<vmem>>, vector<16x2x372xf32>,
    return
  }
}

</mosaic_0001>

<bundles_post_ra>
// kernel: tpu_custom_call.1
= control target key start
LH: loop header
LB: loop body
LE: loop exit
PB: predicated region body
PF: predicated region fallthrough
CT: control target
= control target key end

     0   :  { %v410_v2 = vmov 0   ;;  %s529_s0 = inlined_call_operand.vmem [shape: f32[16,1,1], index: 0, kind: input, shape index: {}]   ;;  %s530_s1 = inlined_call_operand.hbm [shape: f32[16,2,372], index: 1, kind: output, shape index: {}]  }
   0x1   :  { %v11_v0 = vld [vmem:[%s529_s0 + $0x2] sm:$0x1]  ;;  %v9_v1 = vld [vmem:[%s529_s0] sm:$0x1]  ;;  %323 = vset.pattern.permute.xlu1 %v410_v2  ;;  %322 = vset.pattern.permute.xlu0 %v410_v2  ;;  %v12_v5 = vld [vmem:[%s529_s0 + $0x3] sm:$0x1] }
   0x2   :  { %v304_v3 = vmul.f32 -1.442695, %v11_v0  ;;  %v302_v4 = vmul.f32 -1.442695, %v9_v1  ;;  %v305_v6 = vmul.f32 -1.442695, %v12_v5 }
   0x3   :  { %v10_v7 = vld [vmem:[%s529_s0 + $0x1] sm:$0x1]  ;;  %v14_v9 = vld [vmem:[%s529_s0 + $0x5] sm:$0x1]  ;;  %v13_v10 = vld [vmem:[%s529_s0 + $0x4] sm:$0x1] }
   0x4   :  { %324 = vpow2.f32 %v304_v3  ;;  %v303_v8 = vmul.f32 -1.442695, %v10_v7  ;;  %v307_v11 = vmul.f32 -1.442695, %v14_v9  ;;  %v306_v12 = vmul.f32 -1.442695, %v13_v10 }
   0x5   :  { %326 = vpow2.f32 %v302_v4  ;;  %v16_v13 = vld [vmem:[%s529_s0 + $0x7] sm:$0x1]  ;;  %v15_v14 = vld [vmem:[%s529_s0 + $0x6] sm:$0x1]  ;;  %v18_v15 = vld [vmem:[%s529_s0 + $0x9] sm:$0x1] }
   0x6   :  { %328 = vpow2.f32 %v305_v6  ;;  %v309_v16 = vmul.f32 -1.442695, %v16_v13  ;;  %v308_v17 = vmul.f32 -1.442695, %v15_v14  ;;  %v311_v18 = vmul.f32 -1.442695, %v18_v15 }
   0x7   :  { %330 = vpow2.f32 %v303_v8  ;;  %v17_v19 = vld [vmem:[%s529_s0 + $0x8] sm:$0x1]  ;;  %v20_v20 = vld [vmem:[%s529_s0 + $0xb] sm:$0x1]  ;;  %v19_v21 = vld [vmem:[%s529_s0 + $0xa] sm:$0x1] }
   0x8   :  { %332 = vpow2.f32 %v307_v11  ;;  %v310_v22 = vmul.f32 -1.442695, %v17_v19  ;;  %v313_v23 = vmul.f32 -1.442695, %v20_v20  ;;  %v22_v24 = vld [vmem:[%s529_s0 + $0xd] sm:$0x1] }
   0x9   :  { %334 = vpow2.f32 %v306_v12  ;;  %v21_v25 = vld [vmem:[%s529_s0 + $0xc] sm:$0x1]  ;;  %v312_v26 = vmul.f32 -1.442695, %v19_v21  ;;  %v24_v27 = vld [vmem:[%s529_s0 + $0xf] sm:$0x1] }
   0xa   :  { %336 = vpow2.f32 %v309_v16  ;;  %v315_v28 = vmul.f32 -1.442695, %v22_v24  ;;  %v23_v29 = vld [vmem:[%s529_s0 + $0xe] sm:$0x1] }
   0xb   :  { %338 = vpow2.f32 %v308_v17 }
   0xc   :  { %340 = vpow2.f32 %v311_v18 }
   0xd   :  { %6 = vsyncpa [#allocation3], 0  ;;  %342 = vpow2.f32 %v310_v22  ;;  %v314_v30 = vmul.f32 -1.442695, %v21_v25  ;;  %v317_v31 = vmul.f32 -1.442695, %v24_v27  ;;  %v137_v43 = vlaneseq }
   0xe   :  { %344 = vpow2.f32 %v313_v23  ;;  %v316_v32 = vmul.f32 -1.442695, %v23_v29  ;;  %vm265_vm0 = vcmask 1041408   ;;  %vm266_vm1 = vcmask 1043458   ;;  %s411_s0 = smov [#allocation2]  }
   0xf   :  { %346 = vpow2.f32 %v312_v26  ;;  %v138_v52 = vshrl.u32 %v137_v43, 7  ;;  %vm267_vm2 = vmor %vm266_vm1, %vm265_vm0  ;;  %vm268_vm3 = vcmask 947204   ;;  %s291_s9 = sshll.u32 %s411_s0, 4  ;;  %s292_s9 = int_to_ptr.vmem [resolvable:$true] %s291_s9 }
  0x10   :  { %348 = vpow2.f32 %v315_v28  ;;  %vm490_vm4 = vmor %vm268_vm3, %vm267_vm2  ;;  %s388_s10 = scalar_lea.vmem %s292_s9, 1536  ;;  %p393_p1 = scmp.lt.s32.totalorder %s292_s9, %s292_s9 }
  0x11   :  { %v325_v33 = vpop.eup %324  ;;  %350 = vpow2.f32 %v314_v30  ;;  %v472_v59 = vsub.s32 0, %v138_v52  ;;  %p389_p0 = scmp.ne.s32.totalorder %s292_s9, %s388_s10  ;;  %p394_p2 = scmp.lt.s32.totalorder %s388_s10, %s388_s10 }
  0x12   :  { %v327_v34 = vpop.eup %326  ;;  %v75_v35 = vadd.f32 1.0, %v325_v33  ;;  %352 = vpow2.f32 %v317_v31 }
  0x13   :  { %v329_v36 = vpop.eup %328  ;;  %v73_v37 = vadd.f32 1.0, %v327_v34  ;;  %354 = vpow2.f32 %v316_v32  ;;  %p395_p3 = por %p394_p2, %p393_p1 }
  0x14   :  { %v331_v38 = vpop.eup %330  ;;  %356 = vrcp.f32 %v75_v35  ;;  %v76_v39 = vadd.f32 1.0, %v329_v36 }
  0x15   :  { %v333_v40 = vpop.eup %332  ;;  %358 = vrcp.f32 %v73_v37  ;;  %v74_v41 = vadd.f32 1.0, %v331_v38  ;;  %p396_p4 = pnand %p395_p3, %p389_p0 }
  0x16   :  { %v335_v42 = vpop.eup %334  ;;  %360 = vrcp.f32 %v76_v39  ;;  %v78_v44 = vadd.f32 1.0, %v333_v40 }
  0x17   :  { %v337_v45 = vpop.eup %336  ;;  %362 = vrcp.f32 %v74_v41  ;;  %v77_v46 = vadd.f32 1.0, %v335_v42 }
  0x18   :  { %v339_v47 = vpop.eup %338  ;;  %364 = vrcp.f32 %v78_v44  ;;  %v80_v48 = vadd.f32 1.0, %v337_v45 }
  0x19   :  { %v341_v49 = vpop.eup %340  ;;  %366 = vrcp.f32 %v77_v46  ;;  %v79_v50 = vadd.f32 1.0, %v339_v47 }
  0x1a   :  { %v343_v51 = vpop.eup %342  ;;  %368 = vrcp.f32 %v80_v48  ;;  %v82_v55 = vadd.f32 1.0, %v341_v49 }
  0x1b   :  { %v345_v53 = vpop.eup %344  ;;  %370 = vrcp.f32 %v79_v50  ;;  %v81_v57 = vadd.f32 1.0, %v343_v51 }
  0x1c   :  { %v347_v54 = vpop.eup %346  ;;  %372 = vrcp.f32 %v82_v55  ;;  %v84_v62 = vadd.f32 1.0, %v345_v53 }
  0x1d   :  { %v349_v56 = vpop.eup %348  ;;  %374 = vrcp.f32 %v81_v57  ;;  %v83_v0 = vadd.f32 1.0, %v347_v54 }
  0x1e   :  { %v351_v58 = vpop.eup %350  ;;  %376 = vrcp.f32 %v84_v62  ;;  %v86_v7 = vadd.f32 1.0, %v349_v56 }
  0x1f   :  { %v353_v60 = vpop.eup %352  ;;  %378 = vrcp.f32 %v83_v0  ;;  %v85_v10 = vadd.f32 1.0, %v351_v58 }
  0x20   :  { %v355_v61 = vpop.eup %354  ;;  %380 = vrcp.f32 %v86_v7  ;;  %v88_v13 = vadd.f32 1.0, %v353_v60 }
  0x21   :  { %v357_v63 = vpop.eup %356  ;;  %382 = vrcp.f32 %v85_v10  ;;  %v87_v16 = vadd.f32 1.0, %v355_v61 }
  0x22   :  { %v359_v1 = vpop.eup %358  ;;  %v148_v2 = vrot.slane %v357_v63, %v472_v59  ;;  %384 = vrcp.f32 %v88_v13 }
  0x23   :  { %v361_v3 = vpop.eup %360  ;;  %v140_v4 = vrot.slane %v359_v1, %v472_v59  ;;  %386 = vrcp.f32 %v87_v16 }
  0x24   :  { %v363_v5 = vpop.eup %362  ;;  %210 = vperm.xlu1 %323, %v148_v2   ;;  %v152_v6 = vrot.slane %v361_v3, %v472_v59 }
  0x25   :  { %v365_v8 = vpop.eup %364  ;;  %202 = vperm.xlu0 %322, %v140_v4   ;;  %v144_v9 = vrot.slane %v363_v5, %v472_v59 }
  0x26   :  { %v367_v11 = vpop.eup %366  ;;  %v160_v12 = vrot.slane %v365_v8, %v472_v59 }
  0x27   :  { %v369_v14 = vpop.eup %368  ;;  %v156_v15 = vrot.slane %v367_v11, %v472_v59 }
  0x28   :  { %214 = vperm.xlu1 %323, %v152_v6   ;;  %v371_v17 = vpop.eup %370  ;;  %v168_v18 = vrot.slane %v369_v14, %v472_v59 }
  0x29   :  { %206 = vperm.xlu0 %322, %v144_v9   ;;  %v373_v19 = vpop.eup %372  ;;  %v164_v20 = vrot.slane %v371_v17, %v472_v59 }
  0x2a   :  { %v375_v21 = vpop.eup %374  ;;  %v176_v22 = vrot.slane %v373_v19, %v472_v59 }
  0x2b   :  { %v377_v23 = vpop.eup %376  ;;  %v172_v24 = vrot.slane %v375_v21, %v472_v59 }
  0x2c   :  { %222 = vperm.xlu1 %323, %v160_v12   ;;  %v379_v25 = vpop.eup %378  ;;  %v184_v26 = vrot.slane %v377_v23, %v472_v59 }
  0x2d   :  { %218 = vperm.xlu0 %322, %v156_v15   ;;  %v381_v27 = vpop.eup %380  ;;  %v180_v28 = vrot.slane %v379_v25, %v472_v59 }
  0x2e   :  { %v383_v29 = vpop.eup %382  ;;  %v192_v30 = vrot.slane %v381_v27, %v472_v59 }
  0x2f   :  { %v385_v31 = vpop.eup %384  ;;  %v188_v32 = vrot.slane %v383_v29, %v472_v59 }
  0x30   :  { %230 = vperm.xlu1 %323, %v168_v18   ;;  %v387_v33 = vpop.eup %386  ;;  %v200_v34 = vrot.slane %v385_v31, %v472_v59 }
  0x31   :  { %226 = vperm.xlu0 %322, %v164_v20   ;;  %v196_v35 = vrot.slane %v387_v33, %v472_v59 }
  0x34   :  { %238 = vperm.xlu1 %323, %v176_v22  }
  0x35   :  { %234 = vperm.xlu0 %322, %v172_v24  }
  0x38   :  { %246 = vperm.xlu1 %323, %v184_v26  }
  0x39   :  { %242 = vperm.xlu0 %322, %v180_v28  }
  0x3c   :  { %254 = vperm.xlu1 %323, %v192_v30  }
  0x3d   :  { %250 = vperm.xlu0 %322, %v188_v32  }
  0x40   :  { %262 = vperm.xlu1 %323, %v200_v34  }
  0x41   :  { %258 = vperm.xlu0 %322, %v196_v35  }
  0x9f   :  { %v211_v37 = vpop.permute.xlu1 %210 }
  0xa0   :  { %272 = vst.msk [vmem:[#allocation2 + $0xc] sm:$0x3f] %vm490_vm4, %v211_v37  ;;  %v203_v38 = vpop.permute.xlu0 %202 }
  0xa1   :  { %270 = vst.msk [vmem:[#allocation2] sm:$0x3f] %vm490_vm4, %v203_v38 }
  0xa3   :  { %v215_v39 = vpop.permute.xlu1 %214 }
  0xa4   :  { %273 = vst.msk [vmem:[#allocation2 + $0x12] sm:$0x3f] %vm490_vm4, %v215_v39  ;;  %v207_v40 = vpop.permute.xlu0 %206 }
  0xa5   :  { %271 = vst.msk [vmem:[#allocation2 + $0x6] sm:$0x3f] %vm490_vm4, %v207_v40 }
  0xa7   :  { %v223_v41 = vpop.permute.xlu1 %222 }
  0xa8   :  { %275 = vst.msk [vmem:[#allocation2 + $0x1e] sm:$0x3f] %vm490_vm4, %v223_v41  ;;  %v219_v42 = vpop.permute.xlu0 %218 }
  0xa9   :  { %274 = vst.msk [vmem:[#allocation2 + $0x18] sm:$0x3f] %vm490_vm4, %v219_v42 }
  0xab   :  { %v231_v43 = vpop.permute.xlu1 %230 }
  0xac   :  { %277 = vst.msk [vmem:[#allocation2 + $0x2a] sm:$0x3f] %vm490_vm4, %v231_v43  ;;  %v227_v44 = vpop.permute.xlu0 %226 }
  0xad   :  { %276 = vst.msk [vmem:[#allocation2 + $0x24] sm:$0x3f] %vm490_vm4, %v227_v44 }
  0xaf   :  { %v239_v45 = vpop.permute.xlu1 %238 }
  0xb0   :  { %279 = vst.msk [vmem:[#allocation2 + $0x36] sm:$0x3f] %vm490_vm4, %v239_v45  ;;  %v235_v46 = vpop.permute.xlu0 %234 }
  0xb1   :  { %278 = vst.msk [vmem:[#allocation2 + $0x30] sm:$0x3f] %vm490_vm4, %v235_v46 }
  0xb3   :  { %v247_v47 = vpop.permute.xlu1 %246 }
  0xb4   :  { %281 = vst.msk [vmem:[#allocation2 + $0x42] sm:$0x3f] %vm490_vm4, %v247_v47  ;;  %v243_v48 = vpop.permute.xlu0 %242 }
  0xb5   :  { %280 = vst.msk [vmem:[#allocation2 + $0x3c] sm:$0x3f] %vm490_vm4, %v243_v48 }
  0xb7   :  { %v255_v49 = vpop.permute.xlu1 %254 }
  0xb8   :  { %283 = vst.msk [vmem:[#allocation2 + $0x4e] sm:$0x3f] %vm490_vm4, %v255_v49  ;;  %v251_v50 = vpop.permute.xlu0 %250 }
  0xb9   :  { %282 = vst.msk [vmem:[#allocation2 + $0x48] sm:$0x3f] %vm490_vm4, %v251_v50 }
  0xbb   :  { %v263_v51 = vpop.permute.xlu1 %262 }
  0xbc   :  { %285 = vst.msk [vmem:[#allocation2 + $0x5a] sm:$0x3f] %vm490_vm4, %v263_v51  ;;  %v259_v52 = vpop.permute.xlu0 %258 }
  0xbd   :  { %284 = vst.msk [vmem:[#allocation2 + $0x54] sm:$0x3f] %vm490_vm4, %v259_v52 }
  0xbe   :  { %399 = shalt.err (!%p396_p4)
}
  0xbf   :  { %s412_s11 = smov 96   ;;  %s413_s12 = smov 6  }
  0xc0   :  { %297 = dma.vmem_to_hbm [thread:$0]  %s292_s9, 1536, %s530_s1, [#allocation3], %s412_s11, %s412_s11, %s413_s12  }
  0xc1   :  { %408 = dma.done.wait [#allocation3], 1536  }
  0xc2   :  { %409 = vsyncadd [#allocation3], 4294965760 }
  0xc3   :  { %301 = vsyncpa [#allocation3], 1 }

</bundles_post_ra>
